<compile_context>
chip_gen: v7x
topology: tpu7x:2x2x1
jax: 0.10.0
libtpu: 0.0.40
codegen_flags: <defaults>
</compile_context>

<pallas_src>
import functools

import jax
import jax.numpy as jnp
from jax.experimental import pallas as pl
from jax.experimental.pallas import tpu as pltpu

LANE = 128        # vreg lane width  — narrow feature dims are zero-padded to this
SUBLANE = 8       # vreg sublane count — batch is padded to a multiple of this
TILE_B_MAX = 512  # batch rows per grid step; sized for v5e 16 MiB / v7x 32 MiB VMEM


# ---------------------------------------------------------------------------
# Pallas kernel: the entire ensemble forward, fused (2 MXU passes)
# ---------------------------------------------------------------------------

def _fused_ensemble_kernel(x_ref, wf_ref, bf_ref, w2_ref, b2_ref, o_ref):
    """out = relu(x @ W_fused + b_fused) @ W2 + b2.

    W_fused already contains (resize ∘ flatten ∘ sub-linear ∘ concat ∘ fc1)
    folded together and zero-padded to 128 lanes.  Matmuls run in bf16 with
    f32 accumulation; the bias adds and ReLU stay in f32 on the VPU.
    """
    h = jnp.dot(x_ref[...], wf_ref[...], preferred_element_type=jnp.float32)
    h = jnp.maximum(h + bf_ref[...], 0.0)                         # f32 VPU
    out = jnp.dot(h.astype(jnp.bfloat16), w2_ref[...],
                  preferred_element_type=jnp.float32)
    o_ref[...] = (out + b2_ref[...]).astype(o_ref.dtype)


def fused_forward_pallas(x_flat_pad, w_fused, b_fused, w2, b2, tile_b):
    """[B_pad, D_in] bf16 -> lane-dense [B_pad, 128] f32 padded logits."""
    B_pad, d_in = x_flat_pad.shape
    grid = (B_pad // tile_b,)
    return pl.pallas_call(
        _fused_ensemble_kernel,
        out_shape=jax.ShapeDtypeStruct((B_pad, LANE), jnp.float32),
        grid=grid,
        in_specs=[
            pl.BlockSpec((tile_b, d_in), lambda i: (i, 0)),       # streamed x
            pl.BlockSpec(w_fused.shape, lambda i: (0, 0)),        # resident
            pl.BlockSpec(b_fused.shape, lambda i: (0, 0)),        # resident
            pl.BlockSpec(w2.shape, lambda i: (0, 0)),             # resident
            pl.BlockSpec(b2.shape, lambda i: (0, 0)),             # resident
        ],
        out_specs=pl.BlockSpec((tile_b, LANE), lambda i: (i, 0)),
        compiler_params=pltpu.CompilerParams(
            dimension_semantics=("parallel",)),                   # v7x: 2 TCs
    )(x_flat_pad, w_fused, b_fused, w2, b2)


# ---------------------------------------------------------------------------
# Parameter setup: fold resize + fc1 into weights, lane-pad
# ---------------------------------------------------------------------------

def _spatial_resize_matrix(H, W, s):
    """R with flatten(resize(img, (s, s)))[q] == sum_p img_flat[p] * R[p, q]."""
    # TODO(synk): torchvision Resize antialias behaviour differs from
    # jax.image.resize 'bilinear' on downscale; not bit-identical to PyTorch.
    eye = jnp.eye(H * W, dtype=jnp.float32).reshape(H * W, H, W)
    resized = jax.vmap(
        lambda img: jax.image.resize(img, (s, s), method="bilinear"))(eye)
    return resized.reshape(H * W, s * s)


def _pad2(a, rows, cols):
    return jnp.pad(a, ((0, rows - a.shape[0]), (0, cols - a.shape[1])))


def init_params(key, in_channels, H, W, input_sizes, num_classes):
    """Deterministic synthetic parameters.

    Returns (kernel_params, ref_params): kernel_params are fused / folded /
    lane-padded (weights bf16, biases f32); ref_params are the raw f32
    parameters for the pure-JAX reference path.
    """
    M = len(input_sizes)
    assert M * num_classes <= LANE and 16 <= LANE and num_classes <= LANE
    keys = jax.random.split(key, 2 * M + 4)
    k_iter = iter(keys)
    d_img = in_channels * H * W

    raw_sub, w_eff_list, b_list = [], [], []
    for s in input_sizes:
        d_in = in_channels * s * s
        w = jax.random.normal(next(k_iter), (d_in, num_classes), jnp.float32)
        w = w * (1.0 / jnp.sqrt(d_in))
        b = jax.random.normal(next(k_iter), (1, num_classes), jnp.float32) * 0.01
        raw_sub.append((w, b))
        # Fold (bilinear resize + flatten) into the sub-model weight: resize is
        # linear, so flatten(resize(x, s)) @ W == x_flat @ W_eff.
        R = _spatial_resize_matrix(H, W, s)                       # [H*W, s*s]
        w_c = w.reshape(in_channels, s * s, num_classes)
        w_eff = jnp.einsum("pq,cqk->cpk", R, w_c).reshape(d_img, num_classes)
        w_eff_list.append(w_eff)
        b_list.append(b)

    d_cat = M * num_classes
    w_cat = jnp.concatenate(w_eff_list, axis=1)                   # [d_img, M*nc]
    b_cat = jnp.concatenate(b_list, axis=1)                       # [1, M*nc]

    fc1_w = jax.random.normal(next(k_iter), (d_cat, 16), jnp.float32) * (
        1.0 / jnp.sqrt(d_cat))
    fc1_b = jax.random.normal(next(k_iter), (1, 16), jnp.float32) * 0.01
    cls_w = jax.random.normal(next(k_iter), (16, num_classes), jnp.float32) * 0.25
    cls_b = jax.random.normal(next(k_iter), (1, num_classes), jnp.float32) * 0.01

    # Algebraic fold: no nonlinearity between concat and fc1, so fold fc1 into
    # the concatenated sub-model weights.  Fold in f32, cast to bf16 once.
    w_fused = w_cat @ fc1_w                                        # [d_img, 16]
    b_fused = b_cat @ fc1_w + fc1_b                                # [1, 16]

    kernel_params = {
        # zero padding keeps padded lanes exactly 0 through bias, ReLU, matmul
        "w_fused": _pad2(w_fused, d_img, LANE).astype(jnp.bfloat16),
        "b_fused": _pad2(b_fused, 1, LANE),
        "w2": _pad2(cls_w, LANE, LANE).astype(jnp.bfloat16),
        "b2": _pad2(cls_b, 1, LANE),
    }
    ref_params = {"sub": raw_sub, "fc1_w": fc1_w, "fc1_b": fc1_b,
                  "cls_w": cls_w, "cls_b": cls_b}
    return kernel_params, ref_params


# ---------------------------------------------------------------------------
# Forward (single fused Pallas kernel) + pure-JAX reference
# ---------------------------------------------------------------------------

@functools.partial(jax.jit, static_argnames=("num_classes",))
def medium_ensemble_forward(params, x_nchw, num_classes):
    B = x_nchw.shape[0]
    # Flatten + cast to bf16 on the host side (x dominates HBM traffic), then
    # pad the (already half-size) bf16 tensor just enough to fill whole tiles.
    x_flat = x_nchw.reshape(B, -1).astype(jnp.bfloat16)
    B8 = max(SUBLANE, ((B + SUBLANE - 1) // SUBLANE) * SUBLANE)
    tile_b = min(TILE_B_MAX, B8)
    B_pad = ((B8 + tile_b - 1) // tile_b) * tile_b
    x_flat = jnp.pad(x_flat, ((0, B_pad - B), (0, 0)))
    out_pad = fused_forward_pallas(
        x_flat, params["w_fused"], params["b_fused"],
        params["w2"], params["b2"], tile_b)
    return out_pad[:B, :num_classes]


def reference_forward(ref_params, x_nchw, input_sizes):
    """Unfused f32 reference mirroring the PyTorch module (resize -> sub ->
    concat -> fc1 -> ReLU -> classifier)."""
    B, C = x_nchw.shape[:2]
    outs = []
    for (w, b), s in zip(ref_params["sub"], input_sizes):
        r = jax.image.resize(x_nchw, (B, C, s, s), method="bilinear")
        outs.append(r.reshape(B, -1) @ w + b)
    cat = jnp.concatenate(outs, axis=1)
    h = jnp.maximum(cat @ ref_params["fc1_w"] + ref_params["fc1_b"], 0.0)
    return h @ ref_params["cls_w"] + ref_params["cls_b"]


# ---------------------------------------------------------------------------
# Main
# ---------------------------------------------------------------------------

if __name__ == "__main__":
    key = jax.random.PRNGKey(0)
    k_in, k_params = jax.random.split(key)

    B, C, H, W = 2, 4, 16, 16
    num_classes = 10
    input_sizes = (8, 16)          # two synthetic sub-models at different resolutions

    x = jax.random.normal(k_in, (B, C, H, W), jnp.float32)
    params, ref_params = init_params(k_params, C, H, W, input_sizes, num_classes)

    out = medium_ensemble_forward(params, x, num_classes)
    out = jax.block_until_ready(out)

    assert out.shape == (B, num_classes), out.shape
    assert out.dtype == jnp.float32, out.dtype
    assert bool(jnp.all(jnp.isfinite(out)))

    # Tolerance accounts for bf16 matmul operands/inputs + resize/fc1-fold
    # reassociation (folds are done in f32, cast once).
    ref = reference_forward(ref_params, x, input_sizes)
    assert bool(jnp.allclose(out, ref, atol=5e-2, rtol=5e-2)), (
        jnp.max(jnp.abs(out - ref)))

    print("KERNEL_OK")
</pallas_src>

<mosaic_0001>
module attributes {stable_mosaic.version = 11 : i64} {
  func.func @_fused_ensemble_kernel(%arg0: i32, %arg1: memref<8x1024xbf16, #tpu.memory_space<vmem>>, %arg2: memref<1024x128xbf16, #tpu.memory_space<vmem>>, %arg3: memref<1x128xf32, #tpu.memory_space<vmem>>, %arg4: memref<128x128xbf16, #tpu.memory_space<vmem>>, %arg5: memref<1x128xf32, #tpu.memory_space<vmem>>, %arg6: memref<8x128xf32, #tpu.memory_space<vmem>>) attributes {dimension_semantics = [#tpu.dimension_semantics<parallel>], iteration_bounds = array<i64: 1>, scalar_prefetch = 0 : i64, scratch_operands = 0 : i64, tpu.core_type = #tpu.core_type<tc>, window_params = [{transform_indices = @transform_0, window_bounds = array<i64: 8, 1024>}, {pipeline_mode = #tpu.pipeline_mode<synchronous>, transform_indices = @transform_1, window_bounds = array<i64: 1024, 128>}, {pipeline_mode = #tpu.pipeline_mode<synchronous>, transform_indices = @transform_2, window_bounds = array<i64: 1, 128>}, {pipeline_mode = #tpu.pipeline_mode<synchronous>, transform_indices = @transform_3, window_bounds = array<i64: 128, 128>}, {pipeline_mode = #tpu.pipeline_mode<synchronous>, transform_indices = @transform_4, window_bounds = array<i64: 1, 128>}, {transform_indices = @transform_5, window_bounds = array<i64: 8, 128>}]} {
    %c0 = arith.constant 0 : index
    %c0_0 = arith.constant 0 : index
    %0 = vector.load %arg1[%c0, %c0_0] : memref<8x1024xbf16, #tpu.memory_space<vmem>>, vector<8x1024xbf16>
    %c0_1 = arith.constant 0 : index
    %c0_2 = arith.constant 0 : index
    %1 = vector.load %arg2[%c0_1, %c0_2] : memref<1024x128xbf16, #tpu.memory_space<vmem>>, vector<1024x128xbf16>
    %cst = arith.constant dense<0.000000e+00> : vector<8x128xf32>
    %2 = tpu.matmul %0, %1, %cst {dimension_numbers = #tpu.dot_dimension_numbers<[1], [0], [0], [1], [0, 0, 1, 1], [], []>} : vector<8x1024xbf16>, vector<1024x128xbf16>, vector<8x128xf32> -> vector<8x128xf32>
    %c0_3 = arith.constant 0 : index
    %c0_4 = arith.constant 0 : index
    %3 = vector.load %arg3[%c0_3, %c0_4] : memref<1x128xf32, #tpu.memory_space<vmem>>, vector<1x128xf32>
    %4 = vector.broadcast %3 : vector<1x128xf32> to vector<8x128xf32>
    %5 = arith.addf %2, %4 : vector<8x128xf32>
    %cst_5 = arith.constant 0.000000e+00 : f32
    %6 = vector.broadcast %cst_5 : f32 to vector<8x128xf32>
    %7 = arith.maximumf %5, %6 : vector<8x128xf32>
    %8 = arith.truncf %7 : vector<8x128xf32> to vector<8x128xbf16>
    %c0_6 = arith.constant 0 : index
    %c0_7 = arith.constant 0 : index
    %9 = vector.load %arg4[%c0_6, %c0_7] : memref<128x128xbf16, #tpu.memory_space<vmem>>, vector<128x128xbf16>
    %cst_8 = arith.constant dense<0.000000e+00> : vector<8x128xf32>
    %10 = tpu.matmul %8, %9, %cst_8 {dimension_numbers = #tpu.dot_dimension_numbers<[1], [0], [0], [1], [0, 0, 1, 1], [], []>} : vector<8x128xbf16>, vector<128x128xbf16>, vector<8x128xf32> -> vector<8x128xf32>
    %c0_9 = arith.constant 0 : index
    %c0_10 = arith.constant 0 : index
    %11 = vector.load %arg5[%c0_9, %c0_10] : memref<1x128xf32, #tpu.memory_space<vmem>>, vector<1x128xf32>
    %12 = vector.broadcast %11 : vector<1x128xf32> to vector<8x128xf32>
    %13 = arith.addf %10, %12 : vector<8x128xf32>
    %c0_11 = arith.constant 0 : index
    %c0_12 = arith.constant 0 : index
    %14 = vector.load %arg6[%c0_11, %c0_12] : memref<8x128xf32, #tpu.memory_space<vmem>>, vector<8x128xf32>
    tpu.vector_store %arg6[%c0_11, %c0_12], %13 {strides = array<i32>} : memref<8x128xf32, #tpu.memory_space<vmem>>, vector<8x128xf32>,
    return
  }
  func.func @transform_0(%arg0: i32) -> (i32, i32) {
    %c0_i32 = arith.constant 0 : i32
    %c0_i32_0 = arith.constant 0 : i32
    return %arg0, %c0_i32 : i32, i32
  }
  func.func @transform_1(%arg0: i32) -> (i32, i32) {
    %c0_i32 = arith.constant 0 : i32
    %c0_i32_0 = arith.constant 0 : i32
    %c0_i32_1 = arith.constant 0 : i32
    return %c0_i32, %c0_i32_0 : i32, i32
  }
  func.func @transform_2(%arg0: i32) -> (i32, i32) {
    %c0_i32 = arith.constant 0 : i32
    %c0_i32_0 = arith.constant 0 : i32
    %c0_i32_1 = arith.constant 0 : i32
    return %c0_i32, %c0_i32_0 : i32, i32
  }
  func.func @transform_3(%arg0: i32) -> (i32, i32) {
    %c0_i32 = arith.constant 0 : i32
    %c0_i32_0 = arith.constant 0 : i32
    %c0_i32_1 = arith.constant 0 : i32
    return %c0_i32, %c0_i32_0 : i32, i32
  }
  func.func @transform_4(%arg0: i32) -> (i32, i32) {
    %c0_i32 = arith.constant 0 : i32
    %c0_i32_0 = arith.constant 0 : i32
    %c0_i32_1 = arith.constant 0 : i32
    return %c0_i32, %c0_i32_0 : i32, i32
  }
  func.func @transform_5(%arg0: i32) -> (i32, i32) {
    %c0_i32 = arith.constant 0 : i32
    %c0_i32_0 = arith.constant 0 : i32
    return %arg0, %c0_i32 : i32, i32
  }
}

</mosaic_0001>

<bundles_post_ra>
// kernel: medium_ensemble_forward.1
= control target key start
LH: loop header
LB: loop body
LE: loop exit
PB: predicated region body
PF: predicated region fallthrough
CT: control target
= control target key end

     0   :  { %10 = vsyncpa [#allocation3], 0  ;;  %s1173_s18 = smov [#allocation2]   ;;  %s1265_s0 = inlined_call_operand.vmem [shape: bf16[8,1024], index: 0, kind: input, shape index: {}]   ;;  %s1266_s1 = inlined_call_operand.hbm [shape: bf16[1024,128], index: 1, kind: input, shape index: {}]   ;;  %s1267_s2 = inlined_call_operand.vmem [shape: f32[1,128], index: 2, kind: input, shape index: {}]   ;;  %s1268_s3 = inlined_call_operand.vmem [shape: bf16[128,128], index: 3, kind: input, shape index: {}]   ;;  %s1269_s4 = inlined_call_operand.vmem [shape: f32[1,128], index: 4, kind: input, shape index: {}]   ;;  %s1270_s5 = inlined_call_operand.vmem [shape: f32[8,128], index: 5, kind: output, shape index: {}]  }
   0x1   :  { %s18_s19 = sshll.u32 %s1173_s18, 4  ;;  %s1149_s22 = scalar_lea.hbm %s1266_s1, 8192  ;;  %s19_s19 = int_to_ptr.vmem [resolvable:$true] %s18_s19 }
   0x2   :  { %p1150_p0 = scmp.ne.s32.totalorder %s1266_s1, %s1149_s22  ;;  %p1153_p1 = scmp.lt.u32.totalorder %s1149_s22, %s1266_s1 }
   0x4   :  { %p1155_p2 = pnand %p1153_p1, %p1150_p0 }
   0x6   :  { %1158 = shalt.err (!%p1155_p2)
}
   0x7   :  { %s1159_s27 = scalar_lea.vmem %s19_s19, 8192  ;;  %p1164_p4 = scmp.lt.s32.totalorder %s19_s19, %s19_s19 }
   0x8   :  { %p1160_p3 = scmp.ne.s32.totalorder %s19_s19, %s1159_s27  ;;  %p1165_p5 = scmp.lt.s32.totalorder %s1159_s27, %s1159_s27 }
   0xa   :  { %p1166_p6 = por %p1165_p5, %p1164_p4 }
   0xc   :  { %p1167_p7 = pnand %p1166_p6, %p1160_p3 }
   0xe   :  { %1170 = shalt.err (!%p1167_p7)
}
   0xf   :  { %s1174_s28 = smov 64   ;;  %s1175_s29 = smov 4  }
  0x10   :  { %24 = dma.hbm_to_vmem [thread:$0]  %s1266_s1, 8192, %s19_s19, [#allocation3], %s1174_s28, %s1174_s28, %s1175_s29  }
  0x11   :  { %1171 = dma.done.wait [#allocation3], 8192  }
  0x12   :  { %1172 = vsyncadd [#allocation3], 4294959104  ;;  %v1069_v0 = vld [vmem:[#allocation2 + $0x40] sm:$0xff]   ;;  %v1073_v4 = vld [vmem:[#allocation2 + $0x48] sm:$0xff]   ;;  %vm1177_vm0 = vmmov 0  }
  0x13   :  { %v1070_v1 = vld [vmem:[#allocation2 + $0xc0] sm:$0xff]   ;;  %947 = vmatprep.subr.bf16.mxu0 %v1069_v0  ;;  %v1074_v5 = vld [vmem:[#allocation2 + $0xc8] sm:$0xff]   ;;  %v1077_v8 = vld [vmem:[#allocation2 + $0x50] sm:$0xff]  }
  0x14   :  { %v1071_v2 = vld [vmem:[#allocation2] sm:$0xff]   ;;  %969 = vmatprep.subr.bf16.mxu1 %v1070_v1  ;;  %v1075_v6 = vld [vmem:[#allocation2 + $0x8] sm:$0xff]   ;;  %v1078_v9 = vld [vmem:[#allocation2 + $0xd0] sm:$0xff]  }
  0x15   :  { %v1072_v3 = vld [vmem:[#allocation2 + $0x80] sm:$0xff]   ;;  %948 = vmatpush3.bf16.msra.mxu0 %v1071_v2  ;;  %v1076_v7 = vld [vmem:[#allocation2 + $0x88] sm:$0xff]   ;;  %v1079_v10 = vld [vmem:[#allocation2 + $0x10] sm:$0xff]  }
  0x16   :  { %970 = vmatpush3.bf16.msra.mxu1 %v1072_v3  ;;  %949 = vmatprep.subr.bf16.mxu0 %v1073_v4  ;;  %v1080_v11 = vld [vmem:[#allocation2 + $0x90] sm:$0xff]   ;;  %v1081_v12 = vld [vmem:[#allocation2 + $0x58] sm:$0xff]   ;;  %v1085_v16 = vld [vmem:[#allocation2 + $0x60] sm:$0xff]  }
  0x17   :  { %971 = vmatprep.subr.bf16.mxu1 %v1074_v5  ;;  %v1082_v13 = vld [vmem:[#allocation2 + $0xd8] sm:$0xff]   ;;  %v1086_v17 = vld [vmem:[#allocation2 + $0xe0] sm:$0xff]   ;;  %v1089_v20 = vld [vmem:[#allocation2 + $0x68] sm:$0xff]  }
  0x18   :  { %v1083_v14 = vld [vmem:[#allocation2 + $0x18] sm:$0xff]   ;;  %v1087_v18 = vld [vmem:[#allocation2 + $0x20] sm:$0xff]   ;;  %v1090_v21 = vld [vmem:[#allocation2 + $0xe8] sm:$0xff]  }
  0x19   :  { %950 = vmatpush3.bf16.msra.mxu0 %v1075_v6  ;;  %v1084_v15 = vld [vmem:[#allocation2 + $0x98] sm:$0xff]   ;;  %v1088_v19 = vld [vmem:[#allocation2 + $0xa0] sm:$0xff]   ;;  %v1091_v22 = vld [vmem:[#allocation2 + $0x28] sm:$0xff]  }
  0x1a   :  { %972 = vmatpush3.bf16.msra.mxu1 %v1076_v7  ;;  %951 = vmatprep.subr.bf16.mxu0 %v1077_v8  ;;  %v1092_v23 = vld [vmem:[#allocation2 + $0xa8] sm:$0xff]   ;;  %v1093_v24 = vld [vmem:[#allocation2 + $0x70] sm:$0xff]   ;;  %v1097_v28 = vld [vmem:[#allocation2 + $0x78] sm:$0xff]  }
  0x1b   :  { %973 = vmatprep.subr.bf16.mxu1 %v1078_v9  ;;  %v1094_v25 = vld [vmem:[#allocation2 + $0xf0] sm:$0xff]   ;;  %v1098_v29 = vld [vmem:[#allocation2 + $0xf8] sm:$0xff]   ;;  %v35_v32 = vld [vmem:[%s1265_s0] sm:$0xff] }
  0x1c   :  { %v1095_v26 = vld [vmem:[#allocation2 + $0x30] sm:$0xff]   ;;  %v1099_v30 = vld [vmem:[#allocation2 + $0x38] sm:$0xff]   ;;  %v36_v33 = vld [vmem:[%s1265_s0 + $0x8] sm:$0xff]  ;;  %v866_v34 = vcombine.low %v35_v32, %v35_v32  ;;  %v867_v35 = vcombine.high %v35_v32, %v35_v32 }
  0x1d   :  { %952 = vmatpush3.bf16.msra.mxu0 %v1079_v10  ;;  %v1096_v27 = vld [vmem:[#allocation2 + $0xb0] sm:$0xff]   ;;  %v1100_v31 = vld [vmem:[#allocation2 + $0xb8] sm:$0xff]   ;;  %v868_v36 = vcombine.low %v36_v33, %v36_v33  ;;  %v869_v37 = vcombine.high %v36_v33, %v36_v33  ;;  %v1105_v38 = vld [vmem:[#allocation2 + $0x140] sm:$0xff]  }
  0x1e   :  { %974 = vmatpush3.bf16.msra.mxu1 %v1080_v11  ;;  %953 = vmatprep.subr.bf16.mxu0 %v1081_v12  ;;  %v1106_v39 = vld [vmem:[#allocation2 + $0x1c0] sm:$0xff]   ;;  %v1109_v42 = vld [vmem:[#allocation2 + $0x148] sm:$0xff]   ;;  %v1113_v46 = vld [vmem:[#allocation2 + $0x150] sm:$0xff]  }
  0x1f   :  { %975 = vmatprep.subr.bf16.mxu1 %v1082_v13  ;;  %618 = vmatprep.mubr.bf16.mxu0 %v867_v35  ;;  %v1107_v40 = vld [vmem:[#allocation2 + $0x100] sm:$0xff]   ;;  %v1110_v43 = vld [vmem:[#allocation2 + $0x1c8] sm:$0xff]   ;;  %v1114_v47 = vld [vmem:[#allocation2 + $0x1d0] sm:$0xff]   ;;  %v1176_v13 = vmov 0.0  }
  0x20   :  { %658 = vmatprep.mubr.bf16.mxu1 %v869_v37  ;;  %v1108_v41 = vld [vmem:[#allocation2 + $0x180] sm:$0xff]   ;;  %v1111_v44 = vld [vmem:[#allocation2 + $0x108] sm:$0xff]   ;;  %v1115_v48 = vld [vmem:[#allocation2 + $0x110] sm:$0xff]  }
  0x21   :  { %954 = vmatpush3.bf16.msra.mxu0 %v1083_v14  ;;  %v1112_v45 = vld [vmem:[#allocation2 + $0x188] sm:$0xff]   ;;  %v1116_v49 = vld [vmem:[#allocation2 + $0x190] sm:$0xff]   ;;  %v1117_v50 = vld [vmem:[#allocation2 + $0x158] sm:$0xff]  }
  0x22   :  { %976 = vmatpush3.bf16.msra.mxu1 %v1084_v15  ;;  %955 = vmatprep.subr.bf16.mxu0 %v1085_v16  ;;  %v1118_v51 = vld [vmem:[#allocation2 + $0x1d8] sm:$0xff]   ;;  %v1121_v54 = vld [vmem:[#allocation2 + $0x160] sm:$0xff]   ;;  %v1125_v58 = vld [vmem:[#allocation2 + $0x168] sm:$0xff]  }
  0x23   :  { %977 = vmatprep.subr.bf16.mxu1 %v1086_v17  ;;  %v1119_v52 = vld [vmem:[#allocation2 + $0x118] sm:$0xff]   ;;  %v1122_v55 = vld [vmem:[#allocation2 + $0x1e0] sm:$0xff]   ;;  %v1126_v59 = vld [vmem:[#allocation2 + $0x1e8] sm:$0xff]  }
  0x24   :  { %v1120_v53 = vld [vmem:[#allocation2 + $0x198] sm:$0xff]   ;;  %v1123_v56 = vld [vmem:[#allocation2 + $0x120] sm:$0xff]   ;;  %v1127_v60 = vld [vmem:[#allocation2 + $0x128] sm:$0xff]  }
  0x25   :  { %956 = vmatpush3.bf16.msra.mxu0 %v1087_v18  ;;  %v1124_v57 = vld [vmem:[#allocation2 + $0x1a0] sm:$0xff]   ;;  %v1128_v61 = vld [vmem:[#allocation2 + $0x1a8] sm:$0xff]   ;;  %v1129_v62 = vld [vmem:[#allocation2 + $0x170] sm:$0xff]  }
  0x26   :  { %978 = vmatpush3.bf16.msra.mxu1 %v1088_v19  ;;  %957 = vmatprep.subr.bf16.mxu0 %v1089_v20  ;;  %v1130_v63 = vld [vmem:[#allocation2 + $0x1f0] sm:$0xff]   ;;  %v1133_v2 = vld [vmem:[#allocation2 + $0x178] sm:$0xff]   ;;  %v1141_v12 = vld [vmem:[%s1268_s3] sm:$0xff]  }
  0x27   :  { %979 = vmatprep.subr.bf16.mxu1 %v1090_v21  ;;  %v1131_v0 = vld [vmem:[#allocation2 + $0x130] sm:$0xff]   ;;  %v1134_v3 = vld [vmem:[#allocation2 + $0x1f8] sm:$0xff]   ;;  %v1142_v14 = vld [vmem:[%s1268_s3 + $0x8] sm:$0xff]  }
  0x28   :  { %v1132_v1 = vld [vmem:[#allocation2 + $0x1b0] sm:$0xff]   ;;  %v1135_v4 = vld [vmem:[#allocation2 + $0x138] sm:$0xff]   ;;  %v1145_v17 = vld [vmem:[%s1268_s3 + $0x20] sm:$0xff]  }
  0x29   :  { %958 = vmatpush3.bf16.msra.mxu0 %v1091_v22  ;;  %v1136_v5 = vld [vmem:[#allocation2 + $0x1b8] sm:$0xff]   ;;  %v37_v6 = vld [vmem:[%s1265_s0 + $0x10] sm:$0xff]  ;;  %v1146_v18 = vld [vmem:[%s1268_s3 + $0x28] sm:$0xff]  }
  0x2a   :  { %980 = vmatpush3.bf16.msra.mxu1 %v1092_v23  ;;  %959 = vmatprep.subr.bf16.mxu0 %v1093_v24  ;;  %v870_v7 = vcombine.low %v37_v6, %v37_v6  ;;  %v871_v8 = vcombine.high %v37_v6, %v37_v6  ;;  %v38_v9 = vld [vmem:[%s1265_s0 + $0x18] sm:$0xff]  ;;  %v1143_v15 = vld [vmem:[%s1268_s3 + $0x10] sm:$0xff]   ;;  %v865_v23 = vld [vmem:[%s1267_s2] ss:$0 sm:$0xff] }
  0x2b   :  { %981 = vmatprep.subr.bf16.mxu1 %v1094_v25  ;;  %v872_v10 = vcombine.low %v38_v9, %v38_v9  ;;  %v873_v11 = vcombine.high %v38_v9, %v38_v9  ;;  %v1144_v16 = vld [vmem:[%s1268_s3 + $0x18] sm:$0xff]   ;;  %v1147_v19 = vld [vmem:[%s1268_s3 + $0x30] sm:$0xff]  }
  0x2c   :  { %v1148_v20 = vld [vmem:[%s1268_s3 + $0x38] sm:$0xff]  }
  0x2d   :  { %960 = vmatpush3.bf16.msra.mxu0 %v1095_v26 }
  0x2e   :  { %982 = vmatpush3.bf16.msra.mxu1 %v1096_v27  ;;  %961 = vmatprep.subr.bf16.mxu0 %v1097_v28 }
  0x2f   :  { %983 = vmatprep.subr.bf16.mxu1 %v1098_v29 }
  0x31   :  { %962 = vmatpush3.bf16.msra.mxu0 %v1099_v30 }
  0x32   :  { %984 = vmatpush3.bf16.msra.mxu1 %v1100_v31  ;;  %991 = vmatprep.subr.bf16.mxu0 %v1105_v38 }
  0x33   :  { %1013 = vmatprep.subr.bf16.mxu1 %v1106_v39 }
  0x34   :  { %619 = vmatmul.mubr.bf16.vlgmr.msra.gmra.mrb[0].mxu0 %v866_v34 }
  0x35   :  { %659 = vmatmul.mubr.bf16.vlgmr.msra.gmra.mrb[0].mxu1 %v868_v36  ;;  %992 = vmatpush3.bf16.msra.mxu0 %v1107_v40 }
  0x36   :  { %1014 = vmatpush3.bf16.msra.mxu1 %v1108_v41  ;;  %993 = vmatprep.subr.bf16.mxu0 %v1109_v42 }
  0x37   :  { %1015 = vmatprep.subr.bf16.mxu1 %v1110_v43  ;;  %698 = vmatprep.mubr.bf16.mxu0 %v871_v8 }
  0x38   :  { %738 = vmatprep.mubr.bf16.mxu1 %v873_v11 }
  0x39   :  { %994 = vmatpush3.bf16.msra.mxu0 %v1111_v44 }
  0x3a   :  { %1016 = vmatpush3.bf16.msra.mxu1 %v1112_v45  ;;  %995 = vmatprep.subr.bf16.mxu0 %v1113_v46 }
  0x3b   :  { %1017 = vmatprep.subr.bf16.mxu1 %v1114_v47 }
  0x3d   :  { %996 = vmatpush3.bf16.msra.mxu0 %v1115_v48  ;;  %v938_v48 = vld [vmem:[%s1269_s4] ss:$0 sm:$0xff] }
  0x3e   :  { %1018 = vmatpush3.bf16.msra.mxu1 %v1116_v49  ;;  %997 = vmatprep.subr.bf16.mxu0 %v1117_v50 }
  0x3f   :  { %1019 = vmatprep.subr.bf16.mxu1 %v1118_v51 }
  0x41   :  { %998 = vmatpush3.bf16.msra.mxu0 %v1119_v52 }
  0x42   :  { %1020 = vmatpush3.bf16.msra.mxu1 %v1120_v53  ;;  %999 = vmatprep.subr.bf16.mxu0 %v1121_v54 }
  0x43   :  { %1021 = vmatprep.subr.bf16.mxu1 %v1122_v55 }
  0x45   :  { %1000 = vmatpush3.bf16.msra.mxu0 %v1123_v56 }
  0x46   :  { %1022 = vmatpush3.bf16.msra.mxu1 %v1124_v57  ;;  %1001 = vmatprep.subr.bf16.mxu0 %v1125_v58 }
  0x47   :  { %1023 = vmatprep.subr.bf16.mxu1 %v1126_v59 }
  0x49   :  { %1002 = vmatpush3.bf16.msra.mxu0 %v1127_v60 }
  0x4a   :  { %1024 = vmatpush3.bf16.msra.mxu1 %v1128_v61  ;;  %1003 = vmatprep.subr.bf16.mxu0 %v1129_v62 }
  0x4b   :  { %1025 = vmatprep.subr.bf16.mxu1 %v1130_v63 }
  0x4d   :  { %1004 = vmatpush3.bf16.msra.mxu0 %v1131_v0 }
  0x4e   :  { %1026 = vmatpush3.bf16.msra.mxu1 %v1132_v1  ;;  %1005 = vmatprep.subr.bf16.mxu0 %v1133_v2 }
  0x4f   :  { %1027 = vmatprep.subr.bf16.mxu1 %v1134_v3 }
  0x51   :  { %1006 = vmatpush3.bf16.msra.mxu0 %v1135_v4 }
  0x52   :  { %1028 = vmatpush3.bf16.msra.mxu1 %v1136_v5  ;;  %1044 = vmatprep.subr.bf16.mxu0 %v1176_v13 }
  0x54   :  { %699 = vmatmul.mubr.bf16.vlgmr.msra.gmra.mrb[4].mxu0 %v870_v7 }
  0x55   :  { %739 = vmatmul.mubr.bf16.vlgmr.msra.gmra.mrb[4].mxu1 %v872_v10  ;;  %1045 = vmatpush3.bf16.msra.mxu0 %v1141_v12 }
  0x56   :  { %1046 = vmatprep.subr.bf16.mxu0 %v1176_v13  ;;  %1060 = vmatprep.mubr.msk.bf16.mxu0 %vm1177_vm0, %v1176_v13 }
  0x59   :  { %1047 = vmatpush3.bf16.msra.mxu0 %v1142_v14 }
  0x5a   :  { %1048 = vmatprep.subr.bf16.mxu0 %v1176_v13 }
  0x5d   :  { %1049 = vmatpush3.bf16.msra.mxu0 %v1143_v15 }
  0x5e   :  { %1050 = vmatprep.subr.bf16.mxu0 %v1176_v13 }
  0x61   :  { %1051 = vmatpush3.bf16.msra.mxu0 %v1144_v16 }
  0x62   :  { %1052 = vmatprep.subr.bf16.mxu0 %v1176_v13 }
  0x65   :  { %1053 = vmatpush3.bf16.msra.mxu0 %v1145_v17 }
  0x66   :  { %1054 = vmatprep.subr.bf16.mxu0 %v1176_v13 }
  0x69   :  { %1055 = vmatpush3.bf16.msra.mxu0 %v1146_v18 }
  0x6a   :  { %1056 = vmatprep.subr.bf16.mxu0 %v1176_v13 }
  0x6d   :  { %1057 = vmatpush3.bf16.msra.mxu0 %v1147_v19 }
  0x6e   :  { %1058 = vmatprep.subr.bf16.mxu0 %v1176_v13 }
  0x71   :  { %1059 = vmatpush3.bf16.msra.mxu0 %v1148_v20 }
 0x107   :  { %v963_v21 = vpop.f32.mrb[0].mxu0 }
 0x108   :  { %v985_v22 = vpop.f32.mrb[0].mxu1  ;;  %v964_v24 = vpop.f32.mrb[1].mxu0 }
 0x109   :  { %v986_v25 = vpop.f32.mrb[1].mxu1  ;;  %v965_v26 = vadd.f32 %v964_v24, %v963_v21  ;;  %v966_v28 = vpop.f32.mrb[2].mxu0 }
 0x10a   :  { %v987_v27 = vadd.f32 %v986_v25, %v985_v22  ;;  %v988_v29 = vpop.f32.mrb[2].mxu1  ;;  %v967_v30 = vpop.f32.mrb[3].mxu0 }
 0x10b   :  { %v989_v31 = vpop.f32.mrb[3].mxu1  ;;  %v621_v32 = vadd.f32 %v965_v26, %v865_v23 }
 0x10d   :  { %v661_v33 = vadd.f32 %v987_v27, %v621_v32 }
 0x127   :  { %v1007_v34 = vpop.f32.mrb[4].mxu0 }
 0x128   :  { %v1029_v35 = vpop.f32.mrb[4].mxu1  ;;  %v1008_v36 = vpop.f32.mrb[5].mxu0 }
 0x129   :  { %v1030_v37 = vpop.f32.mrb[5].mxu1  ;;  %v1009_v38 = vadd.f32 %v1008_v36, %v1007_v34  ;;  %v1010_v40 = vpop.f32.mrb[6].mxu0 }
 0x12a   :  { %v1031_v39 = vadd.f32 %v1030_v37, %v1029_v35  ;;  %v1032_v41 = vpop.f32.mrb[6].mxu1  ;;  %v1011_v42 = vpop.f32.mrb[7].mxu0 }
 0x12b   :  { %v1033_v43 = vpop.f32.mrb[7].mxu1  ;;  %v701_v44 = vadd.f32 %v1009_v38, %v661_v33 }
 0x12d   :  { %v741_v45 = vadd.f32 %v1031_v39, %v701_v44 }
 0x12f   :  { %v746_v46 = vmax.f32 %v741_v45, 0.0 }
 0x131   :  { %v747_v47 = vpack.c.bf16 %v746_v46, %v746_v46 }
 0x133   :  { %1061 = vmatmul.mubr.bf16.vlgmr.msra.gmra.mrb[8].mxu0 %v747_v47 }
 0x206   :  { %v853_v49 = vpop.f32.mrb[8].mxu0 }
 0x207   :  { %v854_v50 = vadd.f32 %v938_v48, %v853_v49  ;;  %v1062_v51 = vpop.f32.mrb[9].mxu0 }
 0x208   :  { %v856_v52 = vpop.f32.mrb[10].mxu0 }
 0x209   :  { %859 = vst [vmem:[%s1270_s5] sm:$0xff] %v854_v50  ;;  %v1063_v53 = vpop.f32.mrb[11].mxu0 }
 0x20a   :  { %864 = vsyncpa [#allocation3], 1 }

</bundles_post_ra>
